<compile_context>
chip_gen: v5e
topology: v5e:2x2
jax: 0.10.0
libtpu: 0.0.40
codegen_flags: <defaults>
</compile_context>

<pallas_src>
import numpy as np
import jax
import jax.numpy as jnp
from jax.experimental import pallas as pl
from jax.experimental.pallas import tpu as pltpu

SIZES = (1, 2, 3, 6)


# ----------------------------------------------------------------------------
# Static spatial operators (host side, built ONCE per (H, W) -- hoisted)
# ----------------------------------------------------------------------------
def _adaptive_pool_matrix(in_size: int, out_size: int) -> np.ndarray:
    """Row-stochastic M (out, in): M @ v == AdaptiveAvgPool1d(v, out)."""
    m = np.zeros((out_size, in_size), np.float32)
    for i in range(out_size):
        start = (i * in_size) // out_size
        end = -((-(i + 1) * in_size) // out_size)  # ceil((i+1)*in/out)
        m[i, start:end] = 1.0 / (end - start)
    return m


def _bilinear_matrix(out_size: int, in_size: int) -> np.ndarray:
    """M (out, in): M @ v == F.interpolate(v, out, mode='linear', align_corners=False)."""
    m = np.zeros((out_size, in_size), np.float32)
    scale = in_size / out_size
    for i in range(out_size):
        src = max((i + 0.5) * scale - 0.5, 0.0)
        i0 = min(int(np.floor(src)), in_size - 1)
        i1 = min(i0 + 1, in_size - 1)
        lam = src - i0
        m[i, i0] += 1.0 - lam
        m[i, i1] += lam
    return m


def _fold_bn(w, gamma, beta, mean, var, eps=1e-5):
    """Fold eval-mode BatchNorm into a (Cin, Cout) 1x1-conv weight (conv has no bias)."""
    scale = gamma / jnp.sqrt(var + eps)
    w_eff = w * scale[None, :]
    b_eff = (beta - mean * scale)[None, :]  # (1, Cout)
    return w_eff, b_eff


def build_psp_operators(H, W, params, sizes=SIZES):
    """Precompute every constant operand of the fused PSP kernels (host, once)."""
    HW = H * W
    nb = len(sizes)
    blocks = params["blocks"]
    C = blocks[0]["w"].shape[0]
    C4 = blocks[0]["w"].shape[1]
    assert C % nb == 0 and C4 == C // nb, "in_channels must be divisible by len(sizes)"
    w_out = params["out"]["w"]
    assert w_out.shape[0] == 2 * C, "out-conv expects 2*in_channels input rows"
    out_ch = int(w_out.shape[1])

    # Stacked pool / upsample operators and the block-diagonal branch mask.
    kp_rows, ku_cols, slices = [], [], []
    off = 0
    for s in sizes:
        kp = np.kron(_adaptive_pool_matrix(H, s), _adaptive_pool_matrix(W, s))  # (s*s, HW)
        ku = np.kron(_bilinear_matrix(H, s), _bilinear_matrix(W, s))            # (HW, s*s)
        # Exactness guard for the out-bias fold: every upsample block must be
        # row-stochastic (each output pixel's interpolation weights sum to 1).
        assert np.allclose(ku.sum(axis=1), 1.0, atol=1e-5), \
            "bilinear-upsample rows must sum to 1 (bias fold would be wrong)"
        kp_rows.append(kp)
        ku_cols.append(ku)
        slices.append((off, s * s))
        off += s * s
    NP = off                                                   # = 50 for sizes (1,2,3,6)
    kpT = np.concatenate(kp_rows, axis=0).T.astype(np.float32)     # (HW, NP)
    kuT = np.concatenate(ku_cols, axis=1).T.astype(np.float32)     # (NP, HW)
    mask = np.zeros((nb * C4, NP), np.float32)
    for s, (o, ss) in enumerate(slices):
        mask[s * C4:(s + 1) * C4, o:o + ss] = 1.0

    # Fold BN into the 1x1 convs and transpose for the channels-first formulation.
    wsT_list, bs_list = [], []
    for bp in blocks:
        w_eff, b_eff = _fold_bn(bp["w"], bp["gamma"], bp["beta"], bp["mean"], bp["var"])
        wsT_list.append(w_eff.T)                 # (C4, C)
        bs_list.append(b_eff.T)                  # (C4, 1)
    wsT = jnp.concatenate(wsT_list, axis=0)      # (nb*C4, C)
    bs = jnp.concatenate(bs_list, axis=0)        # (nb*C4, 1)
    # Branch bias folded as the LAST weight column; kernel appends a ones row to pooled.
    wsTb = jnp.concatenate([wsT, bs], axis=1).astype(jnp.bfloat16)   # (nb*C4, C+1)

    op = params["out"]
    wo_eff, bo_eff = _fold_bn(op["w"], op["gamma"], op["beta"], op["mean"], op["var"])
    w0T = wo_eff[:C].T.astype(jnp.bfloat16)                          # (out_ch, C)
    woT = jnp.concatenate(
        [wo_eff[C + i * C4: C + (i + 1) * C4].T for i in range(nb)], axis=1
    )                                                                # (out_ch, nb*C4)
    # Out-conv bias pre-divided by nb: each of the nb upsample blocks is row-stochastic,
    # so adding bout/nb to every z column contributes exactly bout to every output pixel.
    bout = bo_eff.T / float(nb)                                      # (out_ch, 1)
    woTb = jnp.concatenate([woT, bout], axis=1).astype(jnp.bfloat16) # (out_ch, nb*C4+1)

    return dict(
        kpT=jnp.asarray(kpT, jnp.bfloat16),
        kuT=jnp.asarray(kuT, jnp.bfloat16),
        mask=jnp.asarray(mask, jnp.float32),
        w0T=w0T, wsTb=wsTb, woTb=woTb,
        out_ch=out_ch, H=int(H), W=int(W), n_np=int(NP),
    )


# ----------------------------------------------------------------------------
# VMEM sizing (generation-aware) and HW tile selection
# ----------------------------------------------------------------------------
def _vmem_capacity_bytes():
    try:
        return int(pltpu.get_tpu_info().vmem_capacity_bytes)
    except Exception:
        return 64 * 1024 * 1024   # conservative: v7x per-TensorCore VMEM


def _vmem_limit(footprint_bytes):
    cap = _vmem_capacity_bytes()
    # actual footprint + margin, never below the 32 MiB scoped default,
    # never above 75% of physical VMEM (keeps headroom for Mosaic scratch).
    return int(min(max(footprint_bytes + (2 << 20), 32 << 20), int(cap * 0.75)))


def _choose_hw_tile(HW, max_lanes=4096):
    """Full HW when small; otherwise the largest multiple of 128 (<= max_lanes) that
    divides HW, so every x / kuT / out tile stays lane-dense and VMEM-bounded."""
    if HW <= max_lanes:
        return HW
    best = None
    for t in range(128, max_lanes + 1, 128):
        if HW % t == 0:
            best = t
    return best if best is not None else HW


# ----------------------------------------------------------------------------
# Phase 1: pooled accumulation over HW tiles -> tiny pyramid tensor z (per batch)
# ----------------------------------------------------------------------------
def _pool_z_kernel(x_ref, kpT_ref, wsTb_ref, mask_ref, woTb_ref, z_ref, acc_ref):
    # x_ref   : (1, C, T)      input HW tile (original dtype; cast in-kernel)
    # kpT_ref : (T, NP)  bf16  stacked adaptive-avg-pool operator rows for this tile
    # wsTb_ref: (NB*C4, C+1)   bf16  stacked branch weights, bias folded as last column
    # mask_ref: (NB*C4, NP)    f32   block-diagonal branch<->pyramid-column mask
    # woTb_ref: (OUT, NB*C4+1) bf16  out-conv branch rows, bout/nb folded as last column
    # z_ref   : (1, OUT, NP)   bf16  pyramid tensor output (written at last tile)
    # acc_ref : (C, NP)        f32   pooled accumulator (VMEM scratch)
    t = pl.program_id(1)

    @pl.when(t == 0)
    def _init():
        acc_ref[...] = jnp.zeros_like(acc_ref)

    xT = x_ref[0].astype(jnp.bfloat16)                                  # cast after load
    acc_ref[...] += jnp.dot(xT, kpT_ref[...], preferred_element_type=jnp.float32)

    @pl.when(t == pl.num_programs(1) - 1)
    def _finalize():
        pooled = acc_ref[...].astype(jnp.bfloat16)                      # (C, NP)
        ones = jnp.ones((1, pooled.shape[1]), jnp.bfloat16)
        pooled_ext = jnp.concatenate([pooled, ones], axis=0)            # (C+1, NP)
        # All four branch 1x1 convs (+folded BN bias) in one stacked matmul.
        u = jnp.dot(wsTb_ref[...], pooled_ext, preferred_element_type=jnp.float32)
        u = jnp.maximum(u, 0.0) * mask_ref[...]                         # ReLU + keep own branch
        u_ext = jnp.concatenate(
            [u.astype(jnp.bfloat16), jnp.ones((1, u.shape[1]), jnp.bfloat16)], axis=0)
        # Out-conv applied to the (still tiny) pyramid columns; bout/nb folded via ones row.
        z = jnp.dot(woTb_ref[...], u_ext, preferred_element_type=jnp.float32)
        z_ref[0] = z.astype(z_ref.dtype)


def _psp_pool_z(x, ops, T):
    N, C, HW = x.shape
    NP = ops["n_np"]
    NBC4 = ops["mask"].shape[0]
    OUT = ops["out_ch"]
    nt = HW // T
    xb = x.dtype.itemsize

    footprint = (2 * C * T * xb            # x tile (double-buffered)
                 + 2 * T * NP * 2          # kpT tile
                 + 2 * NBC4 * (C + 1) * 2  # wsTb (constant; counted conservatively x2)
                 + 2 * NBC4 * NP * 4       # mask
                 + 2 * OUT * (NBC4 + 1) * 2
                 + 2 * OUT * NP * 2        # z output block
                 + C * NP * 4)             # pooled accumulator scratch

    return pl.pallas_call(
        _pool_z_kernel,
        out_shape=jax.ShapeDtypeStruct((N, OUT, NP), jnp.bfloat16),
        grid=(N, nt),
        in_specs=[
            pl.BlockSpec((1, C, T), lambda n, t: (n, 0, t)),       # x tile
            pl.BlockSpec((T, NP), lambda n, t: (t, 0)),            # pool operator tile
            pl.BlockSpec((NBC4, C + 1), lambda n, t: (0, 0)),      # branch weights (+bias col)
            pl.BlockSpec((NBC4, NP), lambda n, t: (0, 0)),         # block-diagonal mask
            pl.BlockSpec((OUT, NBC4 + 1), lambda n, t: (0, 0)),    # out-conv branch rows (+bias col)
        ],
        out_specs=pl.BlockSpec((1, OUT, NP), lambda n, t: (n, 0, 0)),
        scratch_shapes=[pltpu.VMEM((C, NP), jnp.float32)],
        compiler_params=pltpu.CompilerParams(
            dimension_semantics=("parallel", "arbitrary"),
            vmem_limit_bytes=_vmem_limit(footprint),
        ),
    )(x, ops["kpT"], ops["wsTb"], ops["mask"], ops["woTb"])


# ----------------------------------------------------------------------------
# Phase 2: identity path + joint bilinear upsample, per lane-dense HW tile
# ----------------------------------------------------------------------------
def _out_kernel(x_ref, z_ref, kuT_ref, w0T_ref, o_ref):
    # x_ref  : (1, C, T)     input HW tile (original dtype; cast in-kernel)
    # z_ref  : (1, OUT, NP)  bf16  per-batch pyramid tensor from phase 1
    # kuT_ref: (NP, T)       bf16  stacked bilinear-upsample operator tile
    # w0T_ref: (OUT, C)      bf16  out-conv rows for the identity (x) part of the concat
    # o_ref  : (1, OUT, T)   output tile (bf16 by default)
    xT = x_ref[0].astype(jnp.bfloat16)
    # Explicit accumulate of the two MXU contractions (single f32 accumulator;
    # MRB in-place accumulation on v7x).  Out-conv bias is already inside z.
    acc = jnp.dot(w0T_ref[...], xT, preferred_element_type=jnp.float32)
    acc += jnp.dot(z_ref[0], kuT_ref[...], preferred_element_type=jnp.float32)
    o_ref[0] = jnp.maximum(acc, 0.0).astype(o_ref.dtype)


def _psp_out(x, z, ops, T, out_dtype):
    N, C, HW = x.shape
    NP = ops["n_np"]
    OUT = ops["out_ch"]
    nt = HW // T
    xb = x.dtype.itemsize
    ob = jnp.dtype(out_dtype).itemsize

    footprint = (2 * C * T * xb            # x tile
                 + 2 * OUT * NP * 2        # z block
                 + 2 * NP * T * 2          # kuT tile
                 + 2 * OUT * C * 2         # w0T
                 + 2 * OUT * T * ob        # output tile
                 + OUT * T * 4)            # f32 accumulator intermediate

    return pl.pallas_call(
        _out_kernel,
        out_shape=jax.ShapeDtypeStruct((N, OUT, HW), out_dtype),
        grid=(N, nt),
        in_specs=[
            pl.BlockSpec((1, C, T), lambda n, t: (n, 0, t)),       # x tile
            pl.BlockSpec((1, OUT, NP), lambda n, t: (n, 0, 0)),    # z (per batch)
            pl.BlockSpec((NP, T), lambda n, t: (0, t)),            # upsample operator tile
            pl.BlockSpec((OUT, C), lambda n, t: (0, 0)),           # out-conv identity rows
        ],
        out_specs=pl.BlockSpec((1, OUT, T), lambda n, t: (n, 0, t)),
        compiler_params=pltpu.CompilerParams(
            dimension_semantics=("parallel", "parallel"),
            vmem_limit_bytes=_vmem_limit(footprint),
        ),
    )(x, z, ops["kuT"], ops["w0T"])


def psp_module_forward(x_nchw, ops, out_dtype=jnp.bfloat16):
    """PSPModule forward: NCHW in, NCHW out (eval-mode BN folded into the convs)."""
    N, C, H, W = x_nchw.shape
    assert (H, W) == (ops["H"], ops["W"])
    HW = H * W
    x = x_nchw.reshape(N, C, HW)              # NCHW is already channels-first; NO dtype cast here
    T = _choose_hw_tile(HW)
    z = _psp_pool_z(x, ops, T)                # (N, OUT, NP) bf16 -- tiny
    out = _psp_out(x, z, ops, T, out_dtype)   # (N, OUT, HW)
    return out.reshape(N, ops["out_ch"], H, W)


# ----------------------------------------------------------------------------
# Plain-JAX f32 reference (same folded-BN eval semantics) for verification
# ----------------------------------------------------------------------------
def psp_module_reference(x_nchw, params):
    N, C, H, W = x_nchw.shape
    x2 = jnp.transpose(x_nchw, (0, 2, 3, 1)).reshape(N, H * W, C)
    feats = [x2]
    for s, bp in zip(SIZES, params["blocks"]):
        kp = jnp.asarray(np.kron(_adaptive_pool_matrix(H, s), _adaptive_pool_matrix(W, s)))
        ku = jnp.asarray(np.kron(_bilinear_matrix(H, s), _bilinear_matrix(W, s)))
        w_eff, b_eff = _fold_bn(bp["w"], bp["gamma"], bp["beta"], bp["mean"], bp["var"])
        pooled = jnp.einsum("ph,nhc->npc", kp, x2)
        y = jnp.maximum(jnp.einsum("npc,cd->npd", pooled, w_eff) + b_eff[None], 0.0)
        feats.append(jnp.einsum("hp,npd->nhd", ku, y))
    cat = jnp.concatenate(feats, axis=-1)
    w_eff, b_eff = _fold_bn(params["out"]["w"], params["out"]["gamma"],
                            params["out"]["beta"], params["out"]["mean"],
                            params["out"]["var"])
    out2 = jnp.maximum(jnp.einsum("nhc,cd->nhd", cat, w_eff) + b_eff[None], 0.0)
    out_ch = w_eff.shape[1]
    return jnp.transpose(out2.reshape(N, H, W, out_ch), (0, 3, 1, 2))


# ----------------------------------------------------------------------------
# Deterministic parameter construction
# ----------------------------------------------------------------------------
def make_params(in_channels, out_channels, key):
    c4 = in_channels // len(SIZES)
    blocks = []
    for _ in SIZES:
        key, k1, k2, k3, k4, k5 = jax.random.split(key, 6)
        blocks.append(dict(
            w=0.2 * jax.random.normal(k1, (in_channels, c4), jnp.float32),
            gamma=1.0 + 0.1 * jax.random.normal(k2, (c4,), jnp.float32),
            beta=0.1 * jax.random.normal(k3, (c4,), jnp.float32),
            mean=0.1 * jax.random.normal(k4, (c4,), jnp.float32),
            var=0.5 + jnp.abs(jax.random.normal(k5, (c4,), jnp.float32)),
        ))
    key, k1, k2, k3, k4, k5 = jax.random.split(key, 6)
    out = dict(
        w=0.2 * jax.random.normal(k1, (2 * in_channels, out_channels), jnp.float32),
        gamma=1.0 + 0.1 * jax.random.normal(k2, (out_channels,), jnp.float32),
        beta=0.1 * jax.random.normal(k3, (out_channels,), jnp.float32),
        mean=0.1 * jax.random.normal(k4, (out_channels,), jnp.float32),
        var=0.5 + jnp.abs(jax.random.normal(k5, (out_channels,), jnp.float32)),
    )
    return dict(blocks=blocks, out=out)


if __name__ == "__main__":
    N, C, H, W = 2, 8, 16, 16
    OUT_CH = 16

    key = jax.random.PRNGKey(0)
    key, kx = jax.random.split(key)
    x = jax.random.normal(kx, (N, C, H, W), jnp.float32)  # NCHW, like PyTorch
    params = make_params(C, OUT_CH, key)

    # Constant operators are built exactly once and reused across calls (hoisted).
    ops = build_psp_operators(H, W, params)
    fwd = jax.jit(lambda xin: psp_module_forward(xin, ops))

    out = jax.block_until_ready(fwd(x))
    ref = jax.block_until_ready(psp_module_reference(x, params))

    assert out.shape == (N, OUT_CH, H, W), out.shape
    np.testing.assert_allclose(np.asarray(out.astype(jnp.float32)), np.asarray(ref),
                               rtol=3e-2, atol=3e-2)

    print("KERNEL_OK")
</pallas_src>

<mosaic_0001>
module attributes {stable_mosaic.version = 11 : i64} {
  func.func @_out_kernel(%arg0: i32, %arg1: i32, %arg2: memref<1x8x256xf32, #tpu.memory_space<vmem>>, %arg3: memref<1x16x50xbf16, #tpu.memory_space<vmem>>, %arg4: memref<50x256xbf16, #tpu.memory_space<vmem>>, %arg5: memref<16x8xbf16, #tpu.memory_space<vmem>>, %arg6: memref<1x16x256xbf16, #tpu.memory_space<vmem>>) attributes {dimension_semantics = [#tpu.dimension_semantics<parallel>, #tpu.dimension_semantics<parallel>], iteration_bounds = array<i64: 2, 1>, scalar_prefetch = 0 : i64, scratch_operands = 0 : i64, tpu.core_type = #tpu.core_type<tc>, window_params = [{transform_indices = @transform_0, window_bounds = array<i64: 1, 8, 256>}, {transform_indices = @transform_1, window_bounds = array<i64: 1, 16, 50>}, {transform_indices = @transform_2, window_bounds = array<i64: 50, 256>}, {pipeline_mode = #tpu.pipeline_mode<synchronous>, transform_indices = @transform_3, window_bounds = array<i64: 16, 8>}, {transform_indices = @transform_4, window_bounds = array<i64: 1, 16, 256>}]} {
    %c0 = arith.constant 0 : index
    %c0_0 = arith.constant 0 : index
    %c0_1 = arith.constant 0 : index
    %0 = vector.load %arg2[%c0, %c0_0, %c0_1] : memref<1x8x256xf32, #tpu.memory_space<vmem>>, vector<1x8x256xf32>
    %1 = vector.shape_cast %0 : vector<1x8x256xf32> to vector<8x256xf32>
    %2 = arith.truncf %1 : vector<8x256xf32> to vector<8x256xbf16>
    %c0_2 = arith.constant 0 : index
    %c0_3 = arith.constant 0 : index
    %3 = vector.load %arg5[%c0_2, %c0_3] : memref<16x8xbf16, #tpu.memory_space<vmem>>, vector<16x8xbf16>
    %cst = arith.constant dense<0.000000e+00> : vector<16x256xf32>
    %4 = tpu.matmul %3, %2, %cst {dimension_numbers = #tpu.dot_dimension_numbers<[1], [0], [0], [1], [0, 0, 1, 1], [], []>} : vector<16x8xbf16>, vector<8x256xbf16>, vector<16x256xf32> -> vector<16x256xf32>
    %c0_4 = arith.constant 0 : index
    %c0_5 = arith.constant 0 : index
    %c0_6 = arith.constant 0 : index
    %5 = vector.load %arg3[%c0_4, %c0_5, %c0_6] : memref<1x16x50xbf16, #tpu.memory_space<vmem>>, vector<1x16x50xbf16>
    %6 = vector.shape_cast %5 : vector<1x16x50xbf16> to vector<16x50xbf16>
    %c0_7 = arith.constant 0 : index
    %c0_8 = arith.constant 0 : index
    %7 = vector.load %arg4[%c0_7, %c0_8] : memref<50x256xbf16, #tpu.memory_space<vmem>>, vector<50x256xbf16>
    %cst_9 = arith.constant dense<0.000000e+00> : vector<16x256xf32>
    %8 = tpu.matmul %6, %7, %cst_9 {dimension_numbers = #tpu.dot_dimension_numbers<[1], [0], [0], [1], [0, 0, 1, 1], [], []>} : vector<16x50xbf16>, vector<50x256xbf16>, vector<16x256xf32> -> vector<16x256xf32>
    %9 = arith.addf %4, %8 : vector<16x256xf32>
    %cst_10 = arith.constant 0.000000e+00 : f32
    %10 = vector.broadcast %cst_10 : f32 to vector<16x256xf32>
    %11 = arith.maximumf %9, %10 : vector<16x256xf32>
    %12 = arith.truncf %11 : vector<16x256xf32> to vector<16x256xbf16>
    %c0_11 = arith.constant 0 : index
    %c0_12 = arith.constant 0 : index
    %c0_13 = arith.constant 0 : index
    %13 = vector.load %arg6[%c0_11, %c0_12, %c0_13] : memref<1x16x256xbf16, #tpu.memory_space<vmem>>, vector<1x16x256xbf16>
    %14 = vector.shape_cast %13 : vector<1x16x256xbf16> to vector<16x256xbf16>
    %15 = vector.shape_cast %12 : vector<16x256xbf16> to vector<1x16x256xbf16>
    tpu.vector_store %arg6[%c0_11, %c0_12, %c0_13], %15 {strides = array<i32>} : memref<1x16x256xbf16, #tpu.memory_space<vmem>>, vector<1x16x256xbf16>,
    return
  }
  func.func @transform_0(%arg0: i32, %arg1: i32) -> (i32, i32, i32) {
    %c0_i32 = arith.constant 0 : i32
    %c0_i32_0 = arith.constant 0 : i32
    return %arg0, %c0_i32, %arg1 : i32, i32, i32
  }
  func.func @transform_1(%arg0: i32, %arg1: i32) -> (i32, i32, i32) {
    %c0_i32 = arith.constant 0 : i32
    %c0_i32_0 = arith.constant 0 : i32
    %c0_i32_1 = arith.constant 0 : i32
    return %arg0, %c0_i32, %c0_i32_0 : i32, i32, i32
  }
  func.func @transform_2(%arg0: i32, %arg1: i32) -> (i32, i32) {
    %c0_i32 = arith.constant 0 : i32
    %c0_i32_0 = arith.constant 0 : i32
    return %c0_i32, %arg1 : i32, i32
  }
  func.func @transform_3(%arg0: i32, %arg1: i32) -> (i32, i32) {
    %c0_i32 = arith.constant 0 : i32
    %c0_i32_0 = arith.constant 0 : i32
    %c0_i32_1 = arith.constant 0 : i32
    return %c0_i32, %c0_i32_0 : i32, i32
  }
  func.func @transform_4(%arg0: i32, %arg1: i32) -> (i32, i32, i32) {
    %c0_i32 = arith.constant 0 : i32
    %c0_i32_0 = arith.constant 0 : i32
    return %arg0, %c0_i32, %arg1 : i32, i32, i32
  }
}

module attributes {stable_mosaic.version = 11 : i64} {
  func.func @_pool_z_kernel(%arg0: i32, %arg1: i32, %arg2: memref<1x8x256xf32, #tpu.memory_space<vmem>>, %arg3: memref<256x50xbf16, #tpu.memory_space<vmem>>, %arg4: memref<8x9xbf16, #tpu.memory_space<vmem>>, %arg5: memref<8x50xf32, #tpu.memory_space<vmem>>, %arg6: memref<16x9xbf16, #tpu.memory_space<vmem>>, %arg7: memref<1x16x50xbf16, #tpu.memory_space<vmem>>, %arg8: memref<8x50xf32, #tpu.memory_space<vmem>>) attributes {dimension_semantics = [#tpu.dimension_semantics<parallel>, #tpu.dimension_semantics<arbitrary>], iteration_bounds = array<i64: 2, 1>, scalar_prefetch = 0 : i64, scratch_operands = 1 : i64, tpu.core_type = #tpu.core_type<tc>, window_params = [{transform_indices = @transform_0, window_bounds = array<i64: 1, 8, 256>}, {transform_indices = @transform_1, window_bounds = array<i64: 256, 50>}, {pipeline_mode = #tpu.pipeline_mode<synchronous>, transform_indices = @transform_2, window_bounds = array<i64: 8, 9>}, {pipeline_mode = #tpu.pipeline_mode<synchronous>, transform_indices = @transform_3, window_bounds = array<i64: 8, 50>}, {pipeline_mode = #tpu.pipeline_mode<synchronous>, transform_indices = @transform_4, window_bounds = array<i64: 16, 9>}, {transform_indices = @transform_5, window_bounds = array<i64: 1, 16, 50>}]} {
    %c0_i32 = arith.constant 0 : i32
    %0 = arith.cmpi eq, %arg1, %c0_i32 : i32
    %1 = arith.extui %0 : i1 to i32
    %c0_i32_0 = arith.constant 0 : i32
    %2 = arith.cmpi ne, %1, %c0_i32_0 : i32
    scf.if %2 {
      %cst_11 = arith.constant 0.000000e+00 : f32
      %14 = vector.broadcast %cst_11 : f32 to vector<8x50xf32>
      %c0_12 = arith.constant 0 : index
      %c0_13 = arith.constant 0 : index
      %15 = vector.load %arg8[%c0_12, %c0_13] : memref<8x50xf32, #tpu.memory_space<vmem>>, vector<8x50xf32>
      tpu.vector_store %arg8[%c0_12, %c0_13], %14 {strides = array<i32>} : memref<8x50xf32, #tpu.memory_space<vmem>>, vector<8x50xf32>,
    } else {
    }
    %c0 = arith.constant 0 : index
    %c0_1 = arith.constant 0 : index
    %c0_2 = arith.constant 0 : index
    %3 = vector.load %arg2[%c0, %c0_1, %c0_2] : memref<1x8x256xf32, #tpu.memory_space<vmem>>, vector<1x8x256xf32>
    %4 = vector.shape_cast %3 : vector<1x8x256xf32> to vector<8x256xf32>
    %5 = arith.truncf %4 : vector<8x256xf32> to vector<8x256xbf16>
    %c0_3 = arith.constant 0 : index
    %c0_4 = arith.constant 0 : index
    %6 = vector.load %arg8[%c0_3, %c0_4] : memref<8x50xf32, #tpu.memory_space<vmem>>, vector<8x50xf32>
    %c0_5 = arith.constant 0 : index
    %c0_6 = arith.constant 0 : index
    %7 = vector.load %arg3[%c0_5, %c0_6] : memref<256x50xbf16, #tpu.memory_space<vmem>>, vector<256x50xbf16>
    %cst = arith.constant dense<0.000000e+00> : vector<8x50xf32>
    %8 = tpu.matmul %5, %7, %cst {dimension_numbers = #tpu.dot_dimension_numbers<[1], [0], [0], [1], [0, 0, 1, 1], [], []>} : vector<8x256xbf16>, vector<256x50xbf16>, vector<8x50xf32> -> vector<8x50xf32>
    %9 = arith.addf %6, %8 : vector<8x50xf32>
    %c0_7 = arith.constant 0 : index
    %c0_8 = arith.constant 0 : index
    %10 = vector.load %arg8[%c0_7, %c0_8] : memref<8x50xf32, #tpu.memory_space<vmem>>, vector<8x50xf32>
    tpu.vector_store %arg8[%c0_7, %c0_8], %9 {strides = array<i32>} : memref<8x50xf32, #tpu.memory_space<vmem>>, vector<8x50xf32>,
    %c0_i32_9 = arith.constant 0 : i32
    %11 = arith.cmpi eq, %arg1, %c0_i32_9 : i32
    %12 = arith.extui %11 : i1 to i32
    %c0_i32_10 = arith.constant 0 : i32
    %13 = arith.cmpi ne, %12, %c0_i32_10 : i32
    scf.if %13 {
      %c0_11 = arith.constant 0 : index
      %c0_12 = arith.constant 0 : index
      %14 = vector.load %arg8[%c0_11, %c0_12] : memref<8x50xf32, #tpu.memory_space<vmem>>, vector<8x50xf32>
      %15 = arith.truncf %14 : vector<8x50xf32> to vector<8x50xbf16>
      %cst_13 = arith.constant 1.000000e+00 : bf16
      %16 = vector.broadcast %cst_13 : bf16 to vector<1x50xbf16>
      %17 = tpu.concatenate %15, %16 in 0 : vector<8x50xbf16>, vector<1x50xbf16> -> vector<9x50xbf16>
      %c0_14 = arith.constant 0 : index
      %c0_15 = arith.constant 0 : index
      %18 = vector.load %arg4[%c0_14, %c0_15] : memref<8x9xbf16, #tpu.memory_space<vmem>>, vector<8x9xbf16>
      %cst_16 = arith.constant dense<0.000000e+00> : vector<8x50xf32>
      %19 = tpu.matmul %18, %17, %cst_16 {dimension_numbers = #tpu.dot_dimension_numbers<[1], [0], [0], [1], [0, 0, 1, 1], [], []>} : vector<8x9xbf16>, vector<9x50xbf16>, vector<8x50xf32> -> vector<8x50xf32>
      %cst_17 = arith.constant 0.000000e+00 : f32
      %20 = vector.broadcast %cst_17 : f32 to vector<8x50xf32>
      %21 = arith.maximumf %19, %20 : vector<8x50xf32>
      %c0_18 = arith.constant 0 : index
      %c0_19 = arith.constant 0 : index
      %22 = vector.load %arg5[%c0_18, %c0_19] : memref<8x50xf32, #tpu.memory_space<vmem>>, vector<8x50xf32>
      %23 = arith.mulf %21, %22 : vector<8x50xf32>
      %24 = arith.truncf %23 : vector<8x50xf32> to vector<8x50xbf16>
      %cst_20 = arith.constant 1.000000e+00 : bf16
      %25 = vector.broadcast %cst_20 : bf16 to vector<1x50xbf16>
      %26 = tpu.concatenate %24, %25 in 0 : vector<8x50xbf16>, vector<1x50xbf16> -> vector<9x50xbf16>
      %c0_21 = arith.constant 0 : index
      %c0_22 = arith.constant 0 : index
      %27 = vector.load %arg6[%c0_21, %c0_22] : memref<16x9xbf16, #tpu.memory_space<vmem>>, vector<16x9xbf16>
      %cst_23 = arith.constant dense<0.000000e+00> : vector<16x50xf32>
      %28 = tpu.matmul %27, %26, %cst_23 {dimension_numbers = #tpu.dot_dimension_numbers<[1], [0], [0], [1], [0, 0, 1, 1], [], []>} : vector<16x9xbf16>, vector<9x50xbf16>, vector<16x50xf32> -> vector<16x50xf32>
      %29 = arith.truncf %28 : vector<16x50xf32> to vector<16x50xbf16>
      %c0_24 = arith.constant 0 : index
      %c0_25 = arith.constant 0 : index
      %c0_26 = arith.constant 0 : index
      %30 = vector.load %arg7[%c0_24, %c0_25, %c0_26] : memref<1x16x50xbf16, #tpu.memory_space<vmem>>, vector<1x16x50xbf16>
      %31 = vector.shape_cast %30 : vector<1x16x50xbf16> to vector<16x50xbf16>
      %32 = vector.shape_cast %29 : vector<16x50xbf16> to vector<1x16x50xbf16>
      tpu.vector_store %arg7[%c0_24, %c0_25, %c0_26], %32 {strides = array<i32>} : memref<1x16x50xbf16, #tpu.memory_space<vmem>>, vector<1x16x50xbf16>,
    } else {
    }
    return
  }
  func.func @transform_0(%arg0: i32, %arg1: i32) -> (i32, i32, i32) {
    %c0_i32 = arith.constant 0 : i32
    %c0_i32_0 = arith.constant 0 : i32
    return %arg0, %c0_i32, %arg1 : i32, i32, i32
  }
  func.func @transform_1(%arg0: i32, %arg1: i32) -> (i32, i32) {
    %c0_i32 = arith.constant 0 : i32
    %c0_i32_0 = arith.constant 0 : i32
    return %arg1, %c0_i32 : i32, i32
  }
  func.func @transform_2(%arg0: i32, %arg1: i32) -> (i32, i32) {
    %c0_i32 = arith.constant 0 : i32
    %c0_i32_0 = arith.constant 0 : i32
    %c0_i32_1 = arith.constant 0 : i32
    return %c0_i32, %c0_i32_0 : i32, i32
  }
  func.func @transform_3(%arg0: i32, %arg1: i32) -> (i32, i32) {
    %c0_i32 = arith.constant 0 : i32
    %c0_i32_0 = arith.constant 0 : i32
    %c0_i32_1 = arith.constant 0 : i32
    return %c0_i32, %c0_i32_0 : i32, i32
  }
  func.func @transform_4(%arg0: i32, %arg1: i32) -> (i32, i32) {
    %c0_i32 = arith.constant 0 : i32
    %c0_i32_0 = arith.constant 0 : i32
    %c0_i32_1 = arith.constant 0 : i32
    return %c0_i32, %c0_i32_0 : i32, i32
  }
  func.func @transform_5(%arg0: i32, %arg1: i32) -> (i32, i32, i32) {
    %c0_i32 = arith.constant 0 : i32
    %c0_i32_0 = arith.constant 0 : i32
    %c0_i32_1 = arith.constant 0 : i32
    return %arg0, %c0_i32, %c0_i32_0 : i32, i32, i32
  }
}

</mosaic_0001>

<bundles_post_ra>
// kernel: _lambda_.2
= control target key start
LH: loop header
LB: loop body
LE: loop exit
PB: predicated region body
PF: predicated region fallthrough
CT: control target
= control target key end

     0   :  { %s782_s18 = smov 0   ;;  %s784_s19 = smov 0   ;;  %s879_s0 = inlined_call_operand.vmem [shape: f32[2,8,256], index: 0, kind: input, shape index: {}]   ;;  %s880_s1 = inlined_call_operand.vmem [shape: bf16[256,50], index: 1, kind: input, shape index: {}]   ;;  %s881_s2 = inlined_call_operand.vmem [shape: bf16[8,9], index: 2, kind: input, shape index: {}]   ;;  %s882_s3 = inlined_call_operand.vmem [shape: f32[8,50], index: 3, kind: input, shape index: {}]   ;;  %s883_s4 = inlined_call_operand.vmem [shape: bf16[16,9], index: 4, kind: input, shape index: {}]   ;;  %s884_s5 = inlined_call_operand.vmem [shape: bf16[2,16,50], index: 5, kind: output, shape index: {}]  }
   0x1   :  { %s786_s20 = smov 0  }
   0x2 LB: > { %s27_s21 = sadd.s32 1, %s744_s19  ;;  %p604_p0 = scmp.ge.s32.totalorder %s748_s20, 1  ;;  %s748_s20 = sphi %s786_s20, %s15_s20   ;;  %s744_s19 = sphi %s784_s19, %s886_s19   ;;  %s740_s18 = sphi %s782_s18, %s885_s18  }
   0x3   : > { %p29_p1 = scmp.ge.s32.totalorder %s27_s21, 2  ;;  %p217_p2 = scmp.lt.s32.totalorder %s748_s20, 3 }
   0x5   : > { %s888_s21 = smov (%p29_p1, %s27_s21), 0  ;;  %p218_p3 = pnand %p604_p0, %p217_p2 }
   0x6   : > { %p255_p4 = scmp.lt.s32.totalorder (!%p218_p3), %s740_s18, 1 }
   0x7   : > { %221 = sbr.rel (%p218_p3) target bundleno = 478 (0x1de), region = 40 }
   0xc   : > { %v690_v0 = vld [vmem:[%s880_s1 + $0x38] sm:$0xff]  ;;  %v689_v2 = vld [vmem:[%s880_s1 + $0x30] sm:$0xff]  ;;  %v688_v4 = vld [vmem:[%s880_s1 + $0x28] sm:$0xff]  ;;  %s890_s18 = smov (!%p255_p4, %s740_s18), 1  ;;  %vm281_vm0 = vcmask 408576   ;;  %v750_v20 = vmov 0.0  }
   0xd   : > { %v698_v1 = vld [vmem:[%s880_s1 + $0x78] sm:$0xff]  ;;  %416 = vmatpush.bf16.msra.mxu0 %v690_v0  ;;  %v697_v3 = vld [vmem:[%s880_s1 + $0x70] sm:$0xff]  ;;  %v696_v5 = vld [vmem:[%s880_s1 + $0x68] sm:$0xff]  ;;  %s681_s25 = sshll.u32 %s890_s18, 4  ;;  %282 = vst.msk [vmem:[#allocation2] sm:$0xff] %vm281_vm0, %v750_v20  ;;  %vm450_vm1 = vcmask 1043456  }
   0xe   : > { %429 = vmatpush.bf16.msra.mxu1 %v698_v1  ;;  %v687_v6 = vld [vmem:[%s880_s1 + $0x20] sm:$0xff]  ;;  %v686_v8 = vld [vmem:[%s880_s1 + $0x18] sm:$0xff]  ;;  %v685_v10 = vld [vmem:[%s880_s1 + $0x10] sm:$0xff]  ;;  %s262_s7 = scalar_lea.vmem %s879_s0, %s681_s25  ;;  %vm459_vm2 = vcmask 1044480   ;;  %v751_v28 = vmov 65535   ;;  %vm455_vm3 = vcmask 72704  }
   0xf   : > { %v695_v7 = vld [vmem:[%s880_s1 + $0x60] sm:$0xff]  ;;  %v694_v9 = vld [vmem:[%s880_s1 + $0x58] sm:$0xff]  ;;  %v693_v11 = vld [vmem:[%s880_s1 + $0x50] sm:$0xff]  ;;  %v460_v29 = vsel %vm450_vm1, 4294967295, %v751_v28  ;;  %s682_s22 = sshll.u32 %s890_s18, 3  ;;  %vm511_vm4 = vcmask 404480  }
  0x10   : > { %v684_v12 = vld [vmem:[%s880_s1 + $0x8] sm:$0xff]  ;;  %v683_v14 = vld [vmem:[%s880_s1] sm:$0xff]  ;;  %v461_v32 = vsel %vm459_vm2, %v460_v29, 0  ;;  %s274_s25 = scalar_lea.vmem %s884_s5, %s682_s22 }
  0x11   : > { %417 = vmatpush.bf16.msra.mxu0 %v689_v2  ;;  %v692_v13 = vld [vmem:[%s880_s1 + $0x48] sm:$0xff]  ;;  %v691_v15 = vld [vmem:[%s880_s1 + $0x40] sm:$0xff] }
  0x12   : > { %430 = vmatpush.bf16.msra.mxu1 %v697_v3  ;;  %v283_v16 = vld [vmem:[%s262_s7] sm:$0xff]  ;;  %v284_v17 = vld [vmem:[%s262_s7 + $0x8] sm:$0xff] }
  0x13   : > { %v285_v18 = vpack.c.bf16 %v283_v16, %v283_v16  ;;  %v286_v19 = vpack.c.bf16 %v284_v17, %v284_v17  ;;  %v454_v35 = vld [vmem:[%s881_s2] sm:$0xf] }
  0x14   : > { %v287_v22 = vld [vmem:[#allocation2] sm:$0xff] }
  0x15   : > { %418 = vmatpush.bf16.msra.mxu0 %v688_v4  ;;  %v478_v37 = vld [vmem:[%s882_s3] sm:$0xff] }
  0x16   : > { %431 = vmatpush.bf16.msra.mxu1 %v696_v5  ;;  %v699_v44 = vld [vmem:[%s883_s4] sm:$0xff] }
  0x19   : > { %419 = vmatpush.bf16.msra.mxu0 %v687_v6 }
  0x1a   : > { %432 = vmatpush.bf16.msra.mxu1 %v695_v7 }
  0x1d   : > { %420 = vmatpush.bf16.msra.mxu0 %v686_v8 }
  0x1e   : > { %433 = vmatpush.bf16.msra.mxu1 %v694_v9 }
  0x21   : > { %421 = vmatpush.bf16.msra.mxu0 %v685_v10 }
  0x22   : > { %434 = vmatpush.bf16.msra.mxu1 %v693_v11 }
  0x25   : > { %422 = vmatpush.bf16.msra.mxu0 %v684_v12 }
  0x26   : > { %435 = vmatpush.bf16.msra.mxu1 %v692_v13 }
  0x29   : > { %423 = vmatpush.bf16.msra.mxu0 %v683_v14 }
  0x2a   : > { %436 = vmatpush.bf16.msra.mxu1 %v691_v15 }
  0x2c   : > { %424 = vmatmul.bf16.vlgmr.msra.gmra.mxu0 %v285_v18 }
  0x2d   : > { %437 = vmatmul.bf16.vlgmr.msra.gmra.mxu1 %v286_v19 }
  0xa9   : > { %v425_v21 = vpop.f32.mrf.mxu0 }
  0xaa   : > { %v438_v23 = vpop.f32.mrf.mxu1 }
  0xab   : > { %v439_v24 = vadd.f32 %v438_v23, %v425_v21 }
  0xad   : > { %v442_v25 = vadd.f32 %v439_v24, %v287_v22 }
  0xaf   : > { %444 = vst.msk [vmem:[#allocation2] sm:$0xff] %vm281_vm0, %v442_v25 }
  0xb1   : > { %v427_v26 = vpop.f32.mrf.mxu0 }
  0xb2   : > { %v440_v27 = vpop.f32.mrf.mxu1 }
  0xb6   : > { %v448_v30 = vld [vmem:[#allocation2] sm:$0xff] }
  0xb7   : > { %v449_v31 = vpack.c.bf16 %v448_v30, %v448_v30 }
  0xb9   : > { %v453_v33 = vsel %vm450_vm1, %v449_v31, 1065369472 }
  0xba   : > { %v462_v34 = vand.u32 %v461_v32, %v453_v33 }
  0xbc   : > { %471 = vmatpush.bf16.msra.mxu2 %v462_v34 }
  0xbf   : > { %673 = vmatmul.msk.bf16.vlgmr.msra.gmra.mxu2 %vm455_vm3, %v454_v35 }
 0x142   : > { %v473_v36 = vpop.f32.mrf.mxu2 }
 0x143   : > { %v477_v38 = vmax.f32 %v473_v36, 0.0 }
 0x145   : > { %v479_v39 = vmul.f32 %v478_v37, %v477_v38 }
 0x147   : > { %v480_v40 = vpack.c.bf16 %v479_v39, %v479_v39 }
 0x149   : > { %v482_v41 = vsel %vm450_vm1, %v480_v40, 1065369472 }
 0x14a   : > { %v475_v42 = vpop.f32.mrf.mxu2  ;;  %v493_v43 = vand.u32 %v482_v41, %v461_v32 }
 0x14c   : > { %502 = vmatpush.bf16.msra.mxu3 %v493_v43 }
 0x14f   : > { %678 = vmatmul.msk.bf16.vlgmr.msra.gmra.mxu3 %vm455_vm3, %v699_v44 }
 0x1d2   : > { %v504_v45 = vpop.f32.mrf.mxu3 }
 0x1d3   : > { %v509_v46 = vpack.c.bf16 %v504_v45, %v504_v45 }
 0x1d5   : > { %512 = vst.msk [vmem:[%s274_s25] sm:$0xf] %vm511_vm4, %v509_v46 }
 0x1da   : > { %v506_v47 = vpop.f32.mrf.mxu3 }
 0x1db   : > { %v510_v48 = vpack.c.bf16 %v506_v47, %v506_v47 }
 0x1dd   : > { %513 = vst.msk [vmem:[%s274_s25 + $0x4] sm:$0xf] %vm511_vm4, %v510_v48 }
 0x1de PF: > { %s15_s20 = sadd.s32 1, %s748_s20   ;;  %s885_s18 = smov %s744_s19 }
 0x1df   : > { %p12_p5 = scmp.ge.s32.totalorder %s15_s20, 4   ;;  %s886_s19 = smov %s888_s21 }
 0x1e1   :  { %14 = sbr.rel (!%p12_p5) target bundleno = 2 (0x2), region = 81 }

// kernel: _lambda_.3
= control target key start
LH: loop header
LB: loop body
LE: loop exit
PB: predicated region body
PF: predicated region fallthrough
CT: control target
= control target key end

     0   :  { %s674_s15 = smov 0   ;;  %s676_s16 = smov 0   ;;  %s760_s0 = inlined_call_operand.vmem [shape: f32[2,8,256], index: 0, kind: input, shape index: {}]   ;;  %s761_s1 = inlined_call_operand.vmem [shape: bf16[2,16,50], index: 1, kind: input, shape index: {}]   ;;  %s762_s2 = inlined_call_operand.vmem [shape: bf16[50,256], index: 2, kind: input, shape index: {}]   ;;  %s763_s3 = inlined_call_operand.vmem [shape: bf16[16,8], index: 3, kind: input, shape index: {}]   ;;  %s764_s4 = inlined_call_operand.vmem [shape: bf16[2,16,256], index: 4, kind: output, shape index: {}]  }
   0x1   :  { %s678_s17 = smov 0  }
   0x2 LB: > { %s26_s18 = sadd.s32 1, %s643_s16  ;;  %p545_p0 = scmp.ge.s32.totalorder %s647_s17, 1  ;;  %s647_s17 = sphi %s678_s17, %s14_s17   ;;  %s643_s16 = sphi %s676_s16, %s766_s16   ;;  %s639_s15 = sphi %s674_s15, %s765_s15  }
   0x3   : > { %p28_p1 = scmp.ge.s32.totalorder %s26_s18, 2  ;;  %p204_p2 = scmp.lt.s32.totalorder %s647_s17, 3 }
   0x5   : > { %s768_s18 = smov (%p28_p1, %s26_s18), 0  ;;  %p205_p3 = pnand %p545_p0, %p204_p2 }
   0x6   : > { %p249_p4 = scmp.lt.s32.totalorder (!%p205_p3), %s639_s15, 1 }
   0x7   : > { %208 = sbr.rel (%p205_p3) target bundleno = 174 (0xae), region = 36 }
   0xc   : > { %v294_v0 = vld [vmem:[%s762_s2 + $0x30] sm:$0x11]  ;;  %vm339_vm0 = vcmask 1040384   ;;  %v574_v3 = vld [vmem:[%s762_s2 + $0x20] sm:$0xf]  ;;  %s770_s15 = smov (!%p249_p4, %s639_s15), 1 }
   0xd   : > { %v319_v1 = vunpack.c.l.b16 %v294_v0  ;;  %v320_v2 = vunpack.c.h.b16 %v294_v0  ;;  %v600_v6 = vld [vmem:[%s762_s2 + $0x24] sm:$0xf0]  ;;  %v599_v7 = vld [vmem:[%s762_s2 + $0x24] sm:$0xf]  ;;  %v576_v8 = vld [vmem:[%s762_s2 + $0x28] sm:$0xf0] }
   0xe   : > { %s590_s29 = sshll.u32 %s770_s15, 4  ;;  %v575_v11 = vor.u32 %v600_v6, %v574_v3  ;;  %v579_v12 = vor.u32 %v599_v7, %v576_v8  ;;  %vm383_vm1 = vcmask 1043456   ;;  %v566_v17 = vld [vmem:[%s762_s2 + $0x10] sm:$0xf]  ;;  %v598_v18 = vld [vmem:[%s762_s2 + $0x14] sm:$0xf0] }
   0xf   : > { %v327_v4 = vpack.c.b16 %v319_v1, %v319_v1  ;;  %v328_v5 = vpack.c.b16 %v320_v2, %v320_v2  ;;  %s256_s6 = scalar_lea.vmem %s760_s0, %s590_s29  ;;  %v597_v19 = vld [vmem:[%s762_s2 + $0x14] sm:$0xf]  ;;  %v568_v20 = vld [vmem:[%s762_s2 + $0x18] sm:$0xf0]  ;;  %v593_v23 = vld [vmem:[%s763_s3] sm:$0xff]  ;;  %vm379_vm2 = vcmask 64512   ;;  %v567_v24 = vor.u32 %v598_v18, %v566_v17  ;;  %s277_s10 = scalar_lea.vmem %s764_s4, %s590_s29 }
  0x10   : > { %v280_v13 = vld [vmem:[%s256_s6] sm:$0xff]  ;;  %v281_v14 = vld [vmem:[%s256_s6 + $0x8] sm:$0xff]  ;;  %v571_v25 = vor.u32 %v597_v19, %v568_v20  ;;  %s591_s30 = sshll.u32 %s770_s15, 3  ;;  %vm335_vm3 = vcmask 408576  }
  0x11   : > { %v341_v9 = vsel %vm339_vm0, %v327_v4, 0  ;;  %v344_v10 = vsel %vm339_vm0, %v328_v5, 0  ;;  %v282_v15 = vpack.c.bf16 %v280_v13, %v280_v13  ;;  %v283_v16 = vpack.c.bf16 %v281_v14, %v281_v14  ;;  %v558_v26 = vld [vmem:[%s762_s2] sm:$0xf]  ;;  %v596_v27 = vld [vmem:[%s762_s2 + $0x4] sm:$0xf0]  ;;  %s262_s7 = scalar_lea.vmem %s761_s1, %s591_s30 }
  0x12   : > { %350 = vmatpush.bf16.msra.mxu0 %v341_v9  ;;  %364 = vmatpush.bf16.msra.mxu1 %v344_v10  ;;  %v595_v28 = vld [vmem:[%s762_s2 + $0x4] sm:$0xf]  ;;  %v560_v29 = vld [vmem:[%s762_s2 + $0x8] sm:$0xf0]  ;;  %v559_v30 = vor.u32 %v596_v27, %v558_v26 }
  0x13   : > { %v385_v21 = vsel %vm383_vm1, %v282_v15, 0  ;;  %v388_v22 = vsel %vm383_vm1, %v283_v16, 0  ;;  %v563_v31 = vor.u32 %v595_v28, %v560_v29  ;;  %v594_v32 = vld [vmem:[%s262_s7] sm:$0xff] }
  0x14   : > { %397 = vmatpush.bf16.msra.mxu2 %v385_v21  ;;  %411 = vmatpush.bf16.msra.mxu3 %v388_v22 }
  0x16   : > { %351 = vmatpush.bf16.msra.mxu0 %v575_v11  ;;  %365 = vmatpush.bf16.msra.mxu1 %v579_v12 }
  0x17   : > { %586 = vmatmul.msk.bf16.vlgmr.msra.gmra.mxu2 %vm379_vm2, %v593_v23  ;;  %587 = vmatmul.msk.bf16.vlgmr.msra.gmra.mxu3 %vm379_vm2, %v593_v23 }
  0x1a   : > { %352 = vmatpush.bf16.msra.mxu0 %v567_v24  ;;  %366 = vmatpush.bf16.msra.mxu1 %v571_v25 }
  0x1e   : > { %353 = vmatpush.bf16.msra.mxu0 %v559_v30  ;;  %367 = vmatpush.bf16.msra.mxu1 %v563_v31 }
  0x21   : > { %580 = vmatmul.msk.bf16.vlgmr.msra.gmra.mxu0 %vm335_vm3, %v594_v32  ;;  %581 = vmatmul.msk.bf16.vlgmr.msra.gmra.mxu1 %vm335_vm3, %v594_v32 }
  0x9a   : > { %v399_v33 = vpop.f32.mrf.mxu2  ;;  %v413_v34 = vpop.f32.mrf.mxu3 }
  0x9e   : > { %v355_v35 = vpop.f32.mrf.mxu0  ;;  %v369_v36 = vpop.f32.mrf.mxu1 }
  0x9f   : > { %v400_v37 = vadd.f32 %v399_v33, %v355_v35  ;;  %v414_v38 = vadd.f32 %v413_v34, %v369_v36 }
  0xa1   : > { %v418_v39 = vmax.f32 %v400_v37, 0.0  ;;  %v419_v40 = vmax.f32 %v414_v38, 0.0 }
  0xa2   : > { %v401_v42 = vpop.f32.mrf.mxu2  ;;  %v415_v43 = vpop.f32.mrf.mxu3 }
  0xa3   : > { %v422_v41 = vpack.c.bf16 %v419_v40, %v418_v39 }
  0xa5   : > { %424 = vst [vmem:[%s277_s10] sm:$0xff] %v422_v41 }
  0xa6   : > { %v357_v44 = vpop.f32.mrf.mxu0  ;;  %v371_v45 = vpop.f32.mrf.mxu1 }
  0xa7   : > { %v402_v46 = vadd.f32 %v401_v42, %v357_v44  ;;  %v416_v47 = vadd.f32 %v415_v43, %v371_v45 }
  0xa9   : > { %v420_v48 = vmax.f32 %v402_v46, 0.0  ;;  %v421_v49 = vmax.f32 %v416_v47, 0.0 }
  0xab   : > { %v423_v50 = vpack.c.bf16 %v421_v49, %v420_v48 }
  0xad   : > { %425 = vst [vmem:[%s277_s10 + $0x8] sm:$0xff] %v423_v50 }
  0xae PF: > { %s14_s17 = sadd.s32 1, %s647_s17   ;;  %s765_s15 = smov %s643_s16 }
  0xaf   : > { %p11_p5 = scmp.ge.s32.totalorder %s14_s17, 4   ;;  %s766_s16 = smov %s768_s18 }
  0xb1   :  { %13 = sbr.rel (!%p11_p5) target bundleno = 2 (0x2), region = 72 }

</bundles_post_ra>
